<compile_context>
chip_gen: v7x
topology: tpu7x:2x2x1
jax: 0.10.0
libtpu: 0.0.40
codegen_flags: <defaults>
</compile_context>

<pallas_src>
import functools

import jax
import jax.numpy as jnp
from jax import lax
from jax.experimental import pallas as pl
from jax.experimental.pallas import tpu as pltpu


# ---------------------------------------------------------------------------
# Pallas kernels
# ---------------------------------------------------------------------------
def conv_relu_kernel(p_ref, w_ref, b_ref, o_ref):
    # p_ref: [Kp, TL] bf16 patches; w_ref: [OC, Kp] bf16; b_ref: [OC, 1] f32
    # o_ref: [OC, TL] f32 (lane dim = batch*spatial -> lane-dense stores)
    acc = jnp.dot(w_ref[...], p_ref[...], preferred_element_type=jnp.float32)
    o_ref[...] = jnp.maximum(acc + b_ref[...], 0.0).astype(o_ref.dtype)


def conv_relu_pool_kernel(p_ref, w_ref, b_ref, o_ref, *, tl):
    # p_ref: [Kp, 4*TL] bf16 patches, lanes ordered (shift, pos)
    # w_ref: [OC, Kp] bf16; b_ref: [OC, 1] f32; o_ref: [OC, TL] pooled f32
    # One wide MXU matmul for all four 2x2-pool shifts, then a lane-group max.
    acc = jnp.dot(w_ref[...], p_ref[...], preferred_element_type=jnp.float32)
    m = acc[:, 0:tl]
    for s in range(1, 4):
        m = jnp.maximum(m, acc[:, s * tl:(s + 1) * tl])
    # max-then-(bias, ReLU) == (bias, ReLU)-then-max (shared bias, monotone).
    o_ref[...] = jnp.maximum(m + b_ref[...], 0.0).astype(o_ref.dtype)


# ---------------------------------------------------------------------------
# Glue: bf16 im2col built directly in [K, lanes] order (layout plumbing only)
# ---------------------------------------------------------------------------
def _conv_slab(xp, kh, kw, stride, oh, ow):
    # xp: [C, N, Hp, Wp] bf16 -> [K, N*OH*OW]; K ordered (c, i, j) to match
    # weight.reshape(OC, C*KH*KW); lanes ordered (n, oh, ow).
    C, N = xp.shape[0], xp.shape[1]
    taps = [xp[:, :, i:i + stride * oh:stride, j:j + stride * ow:stride]
            for i in range(kh) for j in range(kw)]
    return jnp.stack(taps, axis=1).reshape(C * kh * kw, N * oh * ow)


def _pool_shift_slab(xp, kh, kw, stride, dy, dx, ph, pw):
    # Patch slab for 2x2-pool shift (dy, dx): conv-output row = 2*p + dy, so
    # input row = i + stride*dy + 2*stride*p.  Returns [K, N*PH*PW].
    C, N = xp.shape[0], xp.shape[1]
    s2 = 2 * stride
    taps = [xp[:, :,
               i + stride * dy:i + stride * dy + s2 * ph:s2,
               j + stride * dx:j + stride * dx + s2 * pw:s2]
            for i in range(kh) for j in range(kw)]
    return jnp.stack(taps, axis=1).reshape(C * kh * kw, N * ph * pw)


def _vmem_capacity_bytes(default=64 << 20):
    try:
        return int(getattr(pltpu.get_tpu_info(), "vmem_capacity_bytes", default))
    except Exception:
        return default


def _pick_lane_tile(ltot, kp, oc, slab_mult, vmem_budget, max_tile):
    # Largest multiple-of-128 lane tile TL dividing ltot such that
    # double-buffered slabs (slab_mult*Kp*TL bf16) + double-buffered f32 output
    # + resident weight/bias fit the VMEM budget.
    if ltot % 128 != 0:
        # TODO(synk): lane-pad Ltot to a multiple of 128 for awkward shapes
        # instead of one full-extent (masked-store) tile.
        return ltot
    per_lane = 2 * (slab_mult * kp * 2) + 2 * (oc * 4)
    fixed = 2 * (oc * kp * 2 + oc * 4)
    cap = max(128, (vmem_budget - fixed) // per_lane)
    tl = min(int(max_tile), ltot, int(cap))
    tl -= tl % 128
    tl = max(tl, 128)
    while ltot % tl != 0:
        tl -= 128
    if tl == ltot and ltot > 128:
        # Prefer >=2 grid iterations so both v7x TensorCores get work.
        t = tl - 128
        while t >= 128 and ltot % t != 0:
            t -= 128
        if t >= 128:
            tl = t
    return tl


# ---------------------------------------------------------------------------
# ConvBlock forward: Conv2d -> ReLU [-> MaxPool2d(2)]
# ---------------------------------------------------------------------------
def conv_block_forward(x, weight, bias, *, stride=1, padding=1, pool=True):
    N, C, H, W = x.shape
    OC, IC, KH, KW = weight.shape
    assert IC == C
    K = C * KH * KW
    Kp = -(-K // 16) * 16                       # bf16 sublane-pack multiple

    OH = (H + 2 * padding - KH) // stride + 1
    OW = (W + 2 * padding - KW) // stride + 1

    # Channel-major, padded, bf16 input: one cheap pass over x so every
    # KH*KW-amplified im2col intermediate below is 2-byte, not 4-byte.
    xp = jnp.pad(x.astype(jnp.bfloat16).transpose(1, 0, 2, 3),
                 ((0, 0), (0, 0), (padding, padding), (padding, padding)))

    w2d = jnp.pad(weight.reshape(OC, K).astype(jnp.bfloat16),
                  ((0, 0), (0, Kp - K)))         # [OC, Kp]
    b2d = bias.reshape(OC, 1).astype(jnp.float32)

    vmem_cap = _vmem_capacity_bytes()
    vmem_limit = int(min(vmem_cap * 3 // 4, 128 << 20))
    compiler_params = pltpu.CompilerParams(
        dimension_semantics=("parallel",), vmem_limit_bytes=vmem_limit)

    if pool:
        PH, PW = OH // 2, OW // 2                # floor, as in nn.MaxPool2d(2)
        Ltot = N * PH * PW
        TL = _pick_lane_tile(Ltot, Kp, OC, slab_mult=4,
                             vmem_budget=vmem_cap // 2, max_tile=512)
        T = Ltot // TL
        # Four shift slabs, lane-contiguous per tile: lane = (tile, shift, pos).
        shifts = [_pool_shift_slab(xp, KH, KW, stride, dy, dx, PH, PW)
                  for dy in (0, 1) for dx in (0, 1)]            # 4 x [K, Ltot]
        slab = jnp.stack([s.reshape(K, T, TL) for s in shifts], axis=2)
        slab = jnp.pad(slab.reshape(K, 4 * Ltot), ((0, Kp - K), (0, 0)))

        cost = pl.CostEstimate(
            flops=2 * OC * Kp * 4 * Ltot, transcendentals=0,
            bytes_accessed=(slab.size * 2 + w2d.size * 2 + b2d.size * 4
                            + OC * Ltot * 4))
        out_flat = pl.pallas_call(
            functools.partial(conv_relu_pool_kernel, tl=TL),
            out_shape=jax.ShapeDtypeStruct((OC, Ltot), jnp.float32),
            grid_spec=pltpu.PrefetchScalarGridSpec(
                num_scalar_prefetch=0,
                grid=(T,),
                in_specs=[
                    pl.BlockSpec((Kp, 4 * TL), lambda l: (0, l)),
                    pl.BlockSpec((OC, Kp), lambda l: (0, 0)),
                    pl.BlockSpec((OC, 1), lambda l: (0, 0)),
                ],
                out_specs=pl.BlockSpec((OC, TL), lambda l: (0, l)),
            ),
            compiler_params=compiler_params,
            cost_estimate=cost,
        )(slab, w2d, b2d)
        return (out_flat.reshape(OC, N, PH, PW)
                .transpose(1, 0, 2, 3).astype(x.dtype))

    # No pooling: conv + ReLU only.
    Ltot = N * OH * OW
    TL = _pick_lane_tile(Ltot, Kp, OC, slab_mult=1,
                         vmem_budget=vmem_cap // 2, max_tile=2048)
    slab = jnp.pad(_conv_slab(xp, KH, KW, stride, OH, OW),
                   ((0, Kp - K), (0, 0)))                       # [Kp, Ltot]
    cost = pl.CostEstimate(
        flops=2 * OC * Kp * Ltot, transcendentals=0,
        bytes_accessed=(slab.size * 2 + w2d.size * 2 + b2d.size * 4
                        + OC * Ltot * 4))
    out_flat = pl.pallas_call(
        conv_relu_kernel,
        out_shape=jax.ShapeDtypeStruct((OC, Ltot), jnp.float32),
        grid_spec=pltpu.PrefetchScalarGridSpec(
            num_scalar_prefetch=0,
            grid=(Ltot // TL,),
            in_specs=[
                pl.BlockSpec((Kp, TL), lambda l: (0, l)),
                pl.BlockSpec((OC, Kp), lambda l: (0, 0)),
                pl.BlockSpec((OC, 1), lambda l: (0, 0)),
            ],
            out_specs=pl.BlockSpec((OC, TL), lambda l: (0, l)),
        ),
        compiler_params=compiler_params,
        cost_estimate=cost,
    )(slab, w2d, b2d)
    return (out_flat.reshape(OC, N, OH, OW)
            .transpose(1, 0, 2, 3).astype(x.dtype))


# ---------------------------------------------------------------------------
if __name__ == "__main__":
    # ConvBlock('2d', in_channels=4, out_channels=8, kernel_size=3,
    #           stride=1, padding=1, act_fn=nn.ReLU(), pool_=nn.MaxPool2d(2))
    N, C, H, W = 2, 4, 16, 16
    OC, KH, KW = 8, 3, 3
    stride, padding = 1, 1

    key = jax.random.PRNGKey(0)
    kx, kw_, kb = jax.random.split(key, 3)
    x = jax.random.normal(kx, (N, C, H, W), dtype=jnp.float32)
    weight = jax.random.normal(kw_, (OC, C, KH, KW), dtype=jnp.float32) * 0.1
    bias = jax.random.normal(kb, (OC,), dtype=jnp.float32) * 0.1

    out = conv_block_forward(x, weight, bias, stride=stride, padding=padding,
                             pool=True)
    out = jax.block_until_ready(out)
    assert out.shape == (N, OC, H // 2, W // 2), out.shape

    # Reference (plain JAX), with operands rounded to bf16 to mirror the
    # kernel's bf16 matmul (f32 accumulation in both).
    xr = x.astype(jnp.bfloat16).astype(jnp.float32)
    wr = weight.astype(jnp.bfloat16).astype(jnp.float32)
    ref = lax.conv_general_dilated(
        xr, wr, (stride, stride), [(padding, padding), (padding, padding)],
        dimension_numbers=("NCHW", "OIHW", "NCHW")) + bias.reshape(1, -1, 1, 1)
    ref = jnp.maximum(ref, 0.0)
    ref_pooled = lax.reduce_window(ref, -jnp.inf, lax.max,
                                   (1, 1, 2, 2), (1, 1, 2, 2), "VALID")
    assert jnp.allclose(out, ref_pooled, atol=1e-3, rtol=1e-3), "pooled mismatch"

    # Also exercise the pool_=None path (conv + ReLU only).
    out_np = conv_block_forward(x, weight, bias, stride=stride,
                                padding=padding, pool=False)
    out_np = jax.block_until_ready(out_np)
    assert out_np.shape == (N, OC, H, W), out_np.shape
    assert jnp.allclose(out_np, ref, atol=1e-3, rtol=1e-3), "conv mismatch"

    print("KERNEL_OK")
</pallas_src>

<mosaic_0001>
module attributes {stable_mosaic.version = 11 : i64} {
  func.func @conv_relu_pool_kernel(%arg0: i32, %arg1: memref<48x512xbf16, #tpu.memory_space<vmem>>, %arg2: memref<8x48xbf16, #tpu.memory_space<vmem>>, %arg3: memref<8x1xf32, #tpu.memory_space<vmem>>, %arg4: memref<8x128xf32, #tpu.memory_space<vmem>>) attributes {dimension_semantics = [#tpu.dimension_semantics<parallel>], iteration_bounds = array<i64: 1>, scalar_prefetch = 0 : i64, scratch_operands = 0 : i64, tpu.core_type = #tpu.core_type<tc>, window_params = [{transform_indices = @transform_0, window_bounds = array<i64: 48, 512>}, {pipeline_mode = #tpu.pipeline_mode<synchronous>, transform_indices = @transform_1, window_bounds = array<i64: 8, 48>}, {pipeline_mode = #tpu.pipeline_mode<synchronous>, transform_indices = @transform_2, window_bounds = array<i64: 8, 1>}, {transform_indices = @transform_3, window_bounds = array<i64: 8, 128>}]} {
    %c0 = arith.constant 0 : index
    %c0_0 = arith.constant 0 : index
    %0 = vector.load %arg2[%c0, %c0_0] : memref<8x48xbf16, #tpu.memory_space<vmem>>, vector<8x48xbf16>
    %c0_1 = arith.constant 0 : index
    %c0_2 = arith.constant 0 : index
    %1 = vector.load %arg1[%c0_1, %c0_2] : memref<48x512xbf16, #tpu.memory_space<vmem>>, vector<48x512xbf16>
    %cst = arith.constant dense<0.000000e+00> : vector<8x512xf32>
    %2 = tpu.matmul %0, %1, %cst {dimension_numbers = #tpu.dot_dimension_numbers<[1], [0], [0], [1], [0, 0, 1, 1], [], []>} : vector<8x48xbf16>, vector<48x512xbf16>, vector<8x512xf32> -> vector<8x512xf32>
    %3 = vector.extract_strided_slice %2 {offsets = [0, 0], sizes = [8, 128], strides = [1, 1]} : vector<8x512xf32> to vector<8x128xf32>
    %4 = vector.extract_strided_slice %2 {offsets = [0, 128], sizes = [8, 128], strides = [1, 1]} : vector<8x512xf32> to vector<8x128xf32>
    %5 = arith.maximumf %3, %4 : vector<8x128xf32>
    %6 = vector.extract_strided_slice %2 {offsets = [0, 256], sizes = [8, 128], strides = [1, 1]} : vector<8x512xf32> to vector<8x128xf32>
    %7 = arith.maximumf %5, %6 : vector<8x128xf32>
    %8 = vector.extract_strided_slice %2 {offsets = [0, 384], sizes = [8, 128], strides = [1, 1]} : vector<8x512xf32> to vector<8x128xf32>
    %9 = arith.maximumf %7, %8 : vector<8x128xf32>
    %c0_3 = arith.constant 0 : index
    %c0_4 = arith.constant 0 : index
    %10 = vector.load %arg3[%c0_3, %c0_4] : memref<8x1xf32, #tpu.memory_space<vmem>>, vector<8x1xf32>
    %11 = vector.broadcast %10 : vector<8x1xf32> to vector<8x128xf32>
    %12 = arith.addf %9, %11 : vector<8x128xf32>
    %cst_5 = arith.constant 0.000000e+00 : f32
    %13 = vector.broadcast %cst_5 : f32 to vector<8x128xf32>
    %14 = arith.maximumf %12, %13 : vector<8x128xf32>
    %c0_6 = arith.constant 0 : index
    %c0_7 = arith.constant 0 : index
    %15 = vector.load %arg4[%c0_6, %c0_7] : memref<8x128xf32, #tpu.memory_space<vmem>>, vector<8x128xf32>
    tpu.vector_store %arg4[%c0_6, %c0_7], %14 {strides = array<i32>} : memref<8x128xf32, #tpu.memory_space<vmem>>, vector<8x128xf32>,
    return
  }
  func.func @transform_0(%arg0: i32) -> (i32, i32) {
    %c0_i32 = arith.constant 0 : i32
    %c0_i32_0 = arith.constant 0 : i32
    return %c0_i32, %arg0 : i32, i32
  }
  func.func @transform_1(%arg0: i32) -> (i32, i32) {
    %c0_i32 = arith.constant 0 : i32
    %c0_i32_0 = arith.constant 0 : i32
    %c0_i32_1 = arith.constant 0 : i32
    return %c0_i32, %c0_i32_0 : i32, i32
  }
  func.func @transform_2(%arg0: i32) -> (i32, i32) {
    %c0_i32 = arith.constant 0 : i32
    %c0_i32_0 = arith.constant 0 : i32
    %c0_i32_1 = arith.constant 0 : i32
    return %c0_i32, %c0_i32_0 : i32, i32
  }
  func.func @transform_3(%arg0: i32) -> (i32, i32) {
    %c0_i32 = arith.constant 0 : i32
    %c0_i32_0 = arith.constant 0 : i32
    return %c0_i32, %arg0 : i32, i32
  }
}

</mosaic_0001>

<bundles_post_ra>
// kernel: tpu_custom_call.1
= control target key start
LH: loop header
LB: loop body
LE: loop exit
PB: predicated region body
PF: predicated region fallthrough
CT: control target
= control target key end

     0   :  { %8 = vsyncpa [#allocation3], 0  ;;  %s357_s0 = inlined_call_operand.hbm [shape: bf16[48,512], index: 0, kind: input, shape index: {}]   ;;  %s358_s1 = inlined_call_operand.vmem [shape: bf16[8,48], index: 1, kind: input, shape index: {}]   ;;  %s359_s2 = inlined_call_operand.vmem [shape: f32[8,1], index: 2, kind: input, shape index: {}]   ;;  %s360_s3 = inlined_call_operand.hbm [shape: f32[8,128], index: 3, kind: output, shape index: {}]  }
   0x1   :  { %9 = vsyncpa [#allocation4], 0  ;;  %s302_s12 = smov [#allocation2]   ;;  %s254_s16 = scalar_lea.hbm %s357_s0, 1536 }
   0x2   :  { %s15_s13 = sshll.u32 %s302_s12, 4  ;;  %p255_p0 = scmp.ne.s32.totalorder %s357_s0, %s254_s16  ;;  %s16_s13 = int_to_ptr.vmem [resolvable:$true] %s15_s13 }
   0x3   :  { %p258_p1 = scmp.lt.u32.totalorder %s254_s16, %s357_s0 }
   0x5   :  { %p260_p2 = pnand %p258_p1, %p255_p0 }
   0x7   :  { %263 = shalt.err (!%p260_p2)
}
   0x8   :  { %s264_s21 = scalar_lea.vmem %s16_s13, 1536  ;;  %p269_p4 = scmp.lt.s32.totalorder %s16_s13, %s16_s13 }
   0x9   :  { %p265_p3 = scmp.ne.s32.totalorder %s16_s13, %s264_s21  ;;  %p270_p5 = scmp.lt.s32.totalorder %s264_s21, %s264_s21 }
   0xb   :  { %p271_p6 = por %p270_p5, %p269_p4 }
   0xd   :  { %p272_p7 = pnand %p271_p6, %p265_p3 }
   0xf   :  { %275 = shalt.err (!%p272_p7)
}
  0x10   :  { %s303_s22 = smov 256   ;;  %s304_s23 = smov 16  }
  0x11   :  { %21 = dma.hbm_to_vmem [thread:$0]  %s357_s0, 1536, %s16_s13, [#allocation3], %s303_s22, %s303_s22, %s304_s23  }
  0x12   :  { %298 = dma.done.wait [#allocation3], 1536  }
  0x13   :  { %299 = vsyncadd [#allocation3], 4294965760  ;;  %v305_v0 = vmov 0   ;;  %v236_v1 = vld [vmem:[#allocation2 + $0x4] ss:$16 sps:$4 sm:$0xff]   ;;  %vm103_vm0 = vcmask 392192  }
  0x14   :  { %139 = vmatprep.mubr.bf16.mxu0 %v305_v0  ;;  %180 = vmatprep.mubr.bf16.mxu1 %v305_v0  ;;  %v238_v2 = vld [vmem:[#allocation2 + $0xc] ss:$16 sps:$4 sm:$0xff]   ;;  %v240_v3 = vld [vmem:[#allocation2] ss:$16 sps:$4 sm:$0xff]   ;;  %v241_v4 = vld [vmem:[#allocation2 + $0x8] ss:$16 sps:$4 sm:$0xff]  }
  0x15   :  { %235 = vset.pattern.permute.xlu0 %v305_v0  ;;  %107 = vmatprep.subr.bf16.mxu0 %v236_v1  ;;  %v242_v5 = vld [vmem:[#allocation2 + $0x24] ss:$16 sps:$4 sm:$0xff]   ;;  %v244_v6 = vld [vmem:[#allocation2 + $0x2c] ss:$16 sps:$4 sm:$0xff]   ;;  %v246_v7 = vld [vmem:[#allocation2 + $0x20] ss:$16 sps:$4 sm:$0xff]  }
  0x16   :  { %148 = vmatprep.subr.bf16.mxu1 %v238_v2  ;;  %108 = vmatpush1.bf16.msra.mxu0 %v240_v3  ;;  %v247_v8 = vld [vmem:[#allocation2 + $0x28] ss:$16 sps:$4 sm:$0xff]   ;;  %v248_v9 = vld [vmem:[#allocation2 + $0x44] ss:$16 sps:$4 sm:$0xff]   ;;  %v250_v10 = vld [vmem:[#allocation2 + $0x4c] ss:$16 sps:$4 sm:$0xff]  }
  0x17   :  { %149 = vmatpush1.bf16.msra.mxu1 %v241_v4  ;;  %109 = vmatprep.subr.bf16.mxu0 %v242_v5  ;;  %v252_v11 = vld [vmem:[#allocation2 + $0x40] ss:$16 sps:$4 sm:$0xff]   ;;  %v253_v12 = vld [vmem:[#allocation2 + $0x48] ss:$16 sps:$4 sm:$0xff]  }
  0x18   :  { %150 = vmatprep.subr.bf16.mxu1 %v244_v6  ;;  %v192_v13 = vld [vmem:[%s359_s2] sm:$0xff]  ;;  %s306_s2 = smov [#allocation5]  }
  0x19   :  { %195 = vperm.xlu0 %235, %v192_v13   ;;  %v30_v14 = vld [vmem:[%s358_s1] sm:$0xf]  ;;  %s207_s29 = sshll.u32 %s306_s2, 4  ;;  %s208_s29 = int_to_ptr.vmem [resolvable:$true] %s207_s29 }
  0x1a   :  { %110 = vmatpush1.bf16.msra.mxu0 %v246_v7  ;;  %s276_s1 = scalar_lea.vmem %s208_s29, 128  ;;  %p281_p9 = scmp.lt.s32.totalorder %s208_s29, %s208_s29 }
  0x1b   :  { %151 = vmatpush1.bf16.msra.mxu1 %v247_v8  ;;  %111 = vmatprep.subr.bf16.mxu0 %v248_v9  ;;  %p277_p8 = scmp.ne.s32.totalorder %s208_s29, %s276_s1  ;;  %p282_p10 = scmp.lt.s32.totalorder %s276_s1, %s276_s1 }
  0x1c   :  { %152 = vmatprep.subr.bf16.mxu1 %v250_v10 }
  0x1d   :  { %p283_p11 = por %p282_p10, %p281_p9 }
  0x1e   :  { %112 = vmatpush1.bf16.msra.mxu0 %v252_v11 }
  0x1f   :  { %153 = vmatpush1.bf16.msra.mxu1 %v253_v12  ;;  %p284_p12 = pnand %p283_p11, %p277_p8 }
  0x21   :  { %228 = vmatmul.mubr.msk.bf16.vlgmr.msra.gmra.mrb[0].mxu0 %vm103_vm0, %v30_v14 }
  0x22   :  { %229 = vmatmul.mubr.msk.bf16.vlgmr.msra.gmra.mrb[0].mxu1 %vm103_vm0, %v30_v14 }
  0x98   :  { %v196_v25 = vpop.permute.xlu0 %195 }
  0xf4   :  { %v141_v15 = vpop.f32.mrb[0].mxu0 }
  0xf5   :  { %v182_v16 = vpop.f32.mrb[0].mxu1  ;;  %v143_v17 = vpop.f32.mrb[1].mxu0 }
  0xf6   :  { %v184_v18 = vpop.f32.mrb[1].mxu1  ;;  %v189_v19 = vmax.f32 %v141_v15, %v143_v17  ;;  %v145_v20 = vpop.f32.mrb[2].mxu0 }
  0xf7   :  { %v186_v21 = vpop.f32.mrb[2].mxu1  ;;  %v146_v22 = vpop.f32.mrb[3].mxu0 }
  0xf8   :  { %v187_v23 = vpop.f32.mrb[3].mxu1  ;;  %v190_v24 = vmax.f32 %v189_v19, %v182_v16 }
  0xfa   :  { %v191_v26 = vmax.f32 %v190_v24, %v184_v18 }
  0xfc   :  { %v198_v27 = vadd.f32 %v196_v25, %v191_v26 }
  0xfe   :  { %v199_v28 = vmax.f32 %v198_v27, 0.0 }
 0x100   :  { %200 = vst [vmem:[#allocation5] sm:$0xff] %v199_v28 }
 0x101   :  { %287 = shalt.err (!%p284_p12)
}
 0x102   :  { %s288_s5 = scalar_lea.hbm %s360_s3, 128 }
 0x103   :  { %p289_p13 = scmp.ne.s32.totalorder %s360_s3, %s288_s5  ;;  %p292_p0 = scmp.lt.u32.totalorder %s288_s5, %s360_s3 }
 0x105   :  { %p294_p1 = pnand %p292_p0, %p289_p13 }
 0x107   :  { %297 = shalt.err (!%p294_p1)
}
 0x108   :  { %210 = dma.vmem_to_hbm [thread:$0]  %s208_s29, 128, %s360_s3, [#allocation4]  }
 0x109   :  { %300 = dma.done.wait [#allocation4], 128  }
 0x10a   :  { %301 = vsyncadd [#allocation4], 4294967168 }
 0x10b   :  { %214 = vsyncpa [#allocation3], 1 }
 0x10c   :  { %215 = vsyncpa [#allocation4], 1 }

</bundles_post_ra>
